<compile_context>
chip_gen: v5e
topology: v5e:2x2
jax: 0.10.0
libtpu: 0.0.40
codegen_flags: <defaults>
</compile_context>

<pallas_src>
import jax
import jax.numpy as jnp
from jax.experimental import pallas as pl
from jax.experimental.pallas import tpu as pltpu

OBS_AFTER_PREPROCESSING = 2                    # CartPole-v1
NUM_ACTIONS = 2                                # CartPole-v1 action space
IN_FEATURES = 50 + OBS_AFTER_PREPROCESSING     # 52 (logical)
HIDDEN = 250                                   # logical

# Hardware-aligned (padded) shapes.
IN_PAD = 64        # 52  -> 64   (K dim of first matmul, aligned in-VMEM)
HID_PAD = 256      # 250 -> 256  (lane-aligned hidden width)
OUT_PAD = 128      # lane-full N for the second matmul (w2 padded to 128 cols)
OUT_STORE = 8      # narrow output array actually written back to HBM

MAX_TB = 4096      # max batch tile; ~13 MiB VMEM at 4096 (fits 32 MiB limit)


def _round_up(x, m):
    return (x + m - 1) // m * m


def _choose_tb(batch):
    """Batch tile: full batch for tiny B; otherwise >= 2 grid steps (v7x
    megacore) with a multiple-of-8 tile, capped at MAX_TB."""
    if batch <= 16:
        return max(batch, 1)                       # block == full batch dim (legal)
    tb = _round_up(pl.cdiv(batch, 2), 8)
    return min(MAX_TB, tb)


def qnetwork_kernel(x_ref, w1_ref, b1_ref, w2_ref, b2_ref, o_ref, xpad_ref):
    # Stage the (tb, 52) f32 input tile into a K-aligned (tb, 64) bf16 buffer.
    # Zero first so the padding columns 52:64 are exactly 0 every step (safe
    # under "parallel" semantics — no cross-step scratch carry).
    xpad_ref[...] = jnp.zeros_like(xpad_ref)
    xpad_ref[:, :IN_FEATURES] = x_ref[...].astype(jnp.bfloat16)

    x = xpad_ref[...]                                                   # (tb, 64) bf16
    h = jnp.dot(x, w1_ref[...], preferred_element_type=jnp.float32)    # (tb, 256) f32
    h = jnp.maximum(h + b1_ref[...], 0.0)                              # bias + ReLU, f32

    out = jnp.dot(h.astype(jnp.bfloat16), w2_ref[...],
                  preferred_element_type=jnp.float32)                  # (tb, 128) f32
    # Narrow writeback: only the first OUT_STORE columns go back to HBM.
    o_ref[...] = (out[:, :OUT_STORE] + b2_ref[...]).astype(o_ref.dtype)


def qnetwork_forward(x, w1p, b1p, w2p, b2p):
    """x: [B, IN_FEATURES] f32.
       w1p: [IN_PAD, HID_PAD] bf16, b1p: [1, HID_PAD] f32,
       w2p: [HID_PAD, OUT_PAD] bf16, b2p: [1, OUT_STORE] f32.
       Returns [B, NUM_ACTIONS] f32."""
    B = x.shape[0]
    if B == 0:                                       # degenerate batch
        return jnp.zeros((0, NUM_ACTIONS), jnp.float32)

    tb = _choose_tb(B)
    grid = (pl.cdiv(B, tb),)                         # boundary block masked by Pallas

    out = pl.pallas_call(
        qnetwork_kernel,
        out_shape=jax.ShapeDtypeStruct((B, OUT_STORE), jnp.float32),
        grid=grid,
        in_specs=[
            # x streamed directly (no wrapper pad): last dim 52 == full array dim.
            pl.BlockSpec((tb, IN_FEATURES), lambda i: (i, 0)),
            pl.BlockSpec((IN_PAD, HID_PAD), lambda i: (0, 0)),    # w1: VMEM-resident
            pl.BlockSpec((1, HID_PAD), lambda i: (0, 0)),         # b1: VMEM-resident
            pl.BlockSpec((HID_PAD, OUT_PAD), lambda i: (0, 0)),   # w2: VMEM-resident
            pl.BlockSpec((1, OUT_STORE), lambda i: (0, 0)),       # b2: VMEM-resident
        ],
        out_specs=pl.BlockSpec((tb, OUT_STORE), lambda i: (i, 0)),
        scratch_shapes=[pltpu.VMEM((tb, IN_PAD), jnp.bfloat16)],  # K-aligned x staging
        compiler_params=pltpu.CompilerParams(
            dimension_semantics=("parallel",),        # v7x: shard batch over 2 TCs
            vmem_limit_bytes=32 * 1024 * 1024,        # safe on v5e/v6e/v7x, fits TB=4096
        ),
    )(x, w1p, b1p, w2p, b2p)

    return out[:, :NUM_ACTIONS]


def init_params(key):
    """Logical f32 params mimicking PyTorch nn.Linear default init
    (U[-1/sqrt(fan_in), +1/sqrt(fan_in)]), stored transposed as [in, out]."""
    k1, k2, k3, k4 = jax.random.split(key, 4)
    bound1 = 1.0 / jnp.sqrt(jnp.float32(IN_FEATURES))
    bound2 = 1.0 / jnp.sqrt(jnp.float32(HIDDEN))
    w1 = jax.random.uniform(k1, (IN_FEATURES, HIDDEN), jnp.float32, -bound1, bound1)
    b1 = jax.random.uniform(k2, (HIDDEN,), jnp.float32, -bound1, bound1)
    w2 = jax.random.uniform(k3, (HIDDEN, NUM_ACTIONS), jnp.float32, -bound2, bound2)
    b2 = jax.random.uniform(k4, (NUM_ACTIONS,), jnp.float32, -bound2, bound2)
    return w1, b1, w2, b2


def pack_params(w1, b1, w2, b2):
    """Zero-pad logical params to hardware-aligned shapes; weights cast to bf16.
    Zero padding keeps the math exact (padded K rows / hidden cols contribute 0)."""
    w1p = jnp.zeros((IN_PAD, HID_PAD), jnp.float32).at[:IN_FEATURES, :HIDDEN].set(w1)
    b1p = jnp.zeros((1, HID_PAD), jnp.float32).at[0, :HIDDEN].set(b1)
    w2p = jnp.zeros((HID_PAD, OUT_PAD), jnp.float32).at[:HIDDEN, :NUM_ACTIONS].set(w2)
    b2p = jnp.zeros((1, OUT_STORE), jnp.float32).at[0, :NUM_ACTIONS].set(b2)
    return (w1p.astype(jnp.bfloat16), b1p,
            w2p.astype(jnp.bfloat16), b2p)


if __name__ == "__main__":
    key = jax.random.PRNGKey(0)
    k_params, k_x1, k_x2 = jax.random.split(key, 3)
    w1, b1, w2, b2 = init_params(k_params)
    packed = pack_params(w1, b1, w2, b2)

    fwd = jax.jit(qnetwork_forward)

    def ref_fwd(xv):
        return jnp.maximum(xv @ w1 + b1[None, :], 0.0) @ w2 + b2[None, :]

    # Small single-tile case (block == full batch dim).
    x_small = jax.random.normal(k_x1, (8, IN_FEATURES), jnp.float32)
    out_small = jax.block_until_ready(fwd(x_small, *packed))
    assert out_small.shape == (8, NUM_ACTIONS)
    # bf16 MXU inputs => relaxed tolerance vs the f32 reference.  Note: for a
    # Q-network, argmax over two near-equal Q-values could flip vs exact f32;
    # keep the first matmul in f32 if exact action parity is required.
    assert jnp.allclose(out_small, ref_fwd(x_small), atol=3e-2, rtol=3e-2), \
        f"max abs err {jnp.max(jnp.abs(out_small - ref_fwd(x_small)))}"

    # Larger case: 2-step batch grid (v7x parallel path) + masked remainder block.
    x_big = jax.random.normal(k_x2, (1000, IN_FEATURES), jnp.float32)
    out_big = jax.block_until_ready(fwd(x_big, *packed))
    assert out_big.shape == (1000, NUM_ACTIONS)
    assert jnp.allclose(out_big, ref_fwd(x_big), atol=3e-2, rtol=3e-2), \
        f"max abs err {jnp.max(jnp.abs(out_big - ref_fwd(x_big)))}"

    print("KERNEL_OK")
</pallas_src>

<mosaic_0001>
module attributes {stable_mosaic.version = 11 : i64} {
  func.func @qnetwork_kernel(%arg0: i32, %arg1: memref<8x52xf32, #tpu.memory_space<vmem>>, %arg2: memref<64x256xbf16, #tpu.memory_space<vmem>>, %arg3: memref<1x256xf32, #tpu.memory_space<vmem>>, %arg4: memref<256x128xbf16, #tpu.memory_space<vmem>>, %arg5: memref<1x8xf32, #tpu.memory_space<vmem>>, %arg6: memref<8x8xf32, #tpu.memory_space<vmem>>, %arg7: memref<8x64xbf16, #tpu.memory_space<vmem>>) attributes {dimension_semantics = [#tpu.dimension_semantics<parallel>], iteration_bounds = array<i64: 1>, scalar_prefetch = 0 : i64, scratch_operands = 1 : i64, tpu.core_type = #tpu.core_type<tc>, window_params = [{transform_indices = @transform_0, window_bounds = array<i64: 8, 52>}, {pipeline_mode = #tpu.pipeline_mode<synchronous>, transform_indices = @transform_1, window_bounds = array<i64: 64, 256>}, {pipeline_mode = #tpu.pipeline_mode<synchronous>, transform_indices = @transform_2, window_bounds = array<i64: 1, 256>}, {pipeline_mode = #tpu.pipeline_mode<synchronous>, transform_indices = @transform_3, window_bounds = array<i64: 256, 128>}, {pipeline_mode = #tpu.pipeline_mode<synchronous>, transform_indices = @transform_4, window_bounds = array<i64: 1, 8>}, {transform_indices = @transform_5, window_bounds = array<i64: 8, 8>}]} {
    %cst = arith.constant 0.000000e+00 : bf16
    %0 = vector.broadcast %cst : bf16 to vector<8x64xbf16>
    %c0 = arith.constant 0 : index
    %c0_0 = arith.constant 0 : index
    %1 = vector.load %arg7[%c0, %c0_0] : memref<8x64xbf16, #tpu.memory_space<vmem>>, vector<8x64xbf16>
    tpu.vector_store %arg7[%c0, %c0_0], %0 {strides = array<i32>} : memref<8x64xbf16, #tpu.memory_space<vmem>>, vector<8x64xbf16>,
    %c0_1 = arith.constant 0 : index
    %c0_2 = arith.constant 0 : index
    %2 = vector.load %arg1[%c0_1, %c0_2] : memref<8x52xf32, #tpu.memory_space<vmem>>, vector<8x52xf32>
    %3 = arith.truncf %2 : vector<8x52xf32> to vector<8x52xbf16>
    %c0_3 = arith.constant 0 : index
    %c0_4 = arith.constant 0 : index
    %4 = vector.load %arg7[%c0_3, %c0_4] : memref<8x64xbf16, #tpu.memory_space<vmem>>, vector<8x52xbf16>
    tpu.vector_store %arg7[%c0_3, %c0_4], %3 {strides = array<i32>} : memref<8x64xbf16, #tpu.memory_space<vmem>>, vector<8x52xbf16>,
    %c0_5 = arith.constant 0 : index
    %c0_6 = arith.constant 0 : index
    %5 = vector.load %arg7[%c0_5, %c0_6] : memref<8x64xbf16, #tpu.memory_space<vmem>>, vector<8x64xbf16>
    %c0_7 = arith.constant 0 : index
    %c0_8 = arith.constant 0 : index
    %6 = vector.load %arg2[%c0_7, %c0_8] : memref<64x256xbf16, #tpu.memory_space<vmem>>, vector<64x256xbf16>
    %cst_9 = arith.constant dense<0.000000e+00> : vector<8x256xf32>
    %7 = tpu.matmul %5, %6, %cst_9 {dimension_numbers = #tpu.dot_dimension_numbers<[1], [0], [0], [1], [0, 0, 1, 1], [], []>} : vector<8x64xbf16>, vector<64x256xbf16>, vector<8x256xf32> -> vector<8x256xf32>
    %c0_10 = arith.constant 0 : index
    %c0_11 = arith.constant 0 : index
    %8 = vector.load %arg3[%c0_10, %c0_11] : memref<1x256xf32, #tpu.memory_space<vmem>>, vector<1x256xf32>
    %9 = vector.broadcast %8 : vector<1x256xf32> to vector<8x256xf32>
    %10 = arith.addf %7, %9 : vector<8x256xf32>
    %cst_12 = arith.constant 0.000000e+00 : f32
    %11 = vector.broadcast %cst_12 : f32 to vector<8x256xf32>
    %12 = arith.maximumf %10, %11 : vector<8x256xf32>
    %13 = arith.truncf %12 : vector<8x256xf32> to vector<8x256xbf16>
    %c0_13 = arith.constant 0 : index
    %c0_14 = arith.constant 0 : index
    %14 = vector.load %arg4[%c0_13, %c0_14] : memref<256x128xbf16, #tpu.memory_space<vmem>>, vector<256x128xbf16>
    %cst_15 = arith.constant dense<0.000000e+00> : vector<8x128xf32>
    %15 = tpu.matmul %13, %14, %cst_15 {dimension_numbers = #tpu.dot_dimension_numbers<[1], [0], [0], [1], [0, 0, 1, 1], [], []>} : vector<8x256xbf16>, vector<256x128xbf16>, vector<8x128xf32> -> vector<8x128xf32>
    %16 = vector.extract_strided_slice %15 {offsets = [0, 0], sizes = [8, 8], strides = [1, 1]} : vector<8x128xf32> to vector<8x8xf32>
    %c0_16 = arith.constant 0 : index
    %c0_17 = arith.constant 0 : index
    %17 = vector.load %arg5[%c0_16, %c0_17] : memref<1x8xf32, #tpu.memory_space<vmem>>, vector<1x8xf32>
    %18 = vector.broadcast %17 : vector<1x8xf32> to vector<8x8xf32>
    %19 = arith.addf %16, %18 : vector<8x8xf32>
    %c0_18 = arith.constant 0 : index
    %c0_19 = arith.constant 0 : index
    %20 = vector.load %arg6[%c0_18, %c0_19] : memref<8x8xf32, #tpu.memory_space<vmem>>, vector<8x8xf32>
    tpu.vector_store %arg6[%c0_18, %c0_19], %19 {strides = array<i32>} : memref<8x8xf32, #tpu.memory_space<vmem>>, vector<8x8xf32>,
    return
  }
  func.func @transform_0(%arg0: i32) -> (i32, i32) {
    %c0_i32 = arith.constant 0 : i32
    %c0_i32_0 = arith.constant 0 : i32
    return %arg0, %c0_i32 : i32, i32
  }
  func.func @transform_1(%arg0: i32) -> (i32, i32) {
    %c0_i32 = arith.constant 0 : i32
    %c0_i32_0 = arith.constant 0 : i32
    %c0_i32_1 = arith.constant 0 : i32
    return %c0_i32, %c0_i32_0 : i32, i32
  }
  func.func @transform_2(%arg0: i32) -> (i32, i32) {
    %c0_i32 = arith.constant 0 : i32
    %c0_i32_0 = arith.constant 0 : i32
    %c0_i32_1 = arith.constant 0 : i32
    return %c0_i32, %c0_i32_0 : i32, i32
  }
  func.func @transform_3(%arg0: i32) -> (i32, i32) {
    %c0_i32 = arith.constant 0 : i32
    %c0_i32_0 = arith.constant 0 : i32
    %c0_i32_1 = arith.constant 0 : i32
    return %c0_i32, %c0_i32_0 : i32, i32
  }
  func.func @transform_4(%arg0: i32) -> (i32, i32) {
    %c0_i32 = arith.constant 0 : i32
    %c0_i32_0 = arith.constant 0 : i32
    %c0_i32_1 = arith.constant 0 : i32
    return %c0_i32, %c0_i32_0 : i32, i32
  }
  func.func @transform_5(%arg0: i32) -> (i32, i32) {
    %c0_i32 = arith.constant 0 : i32
    %c0_i32_0 = arith.constant 0 : i32
    return %arg0, %c0_i32 : i32, i32
  }
}

</mosaic_0001>

<bundles_post_ra>
// kernel: qnetwork_forward.1
= control target key start
LH: loop header
LB: loop body
LE: loop exit
PB: predicated region body
PF: predicated region fallthrough
CT: control target
= control target key end

     0   :  { %10 = vsyncpa [#allocation4], 0  ;;  %s634_s0 = inlined_call_operand.hbm [shape: f32[8,52], index: 0, kind: input, shape index: {}]   ;;  %s635_s1 = inlined_call_operand.hbm [shape: bf16[64,256], index: 1, kind: input, shape index: {}]   ;;  %s636_s2 = inlined_call_operand.hbm [shape: f32[1,256], index: 2, kind: input, shape index: {}]   ;;  %s637_s3 = inlined_call_operand.hbm [shape: bf16[256,128], index: 3, kind: input, shape index: {}]   ;;  %s638_s4 = inlined_call_operand.vmem [shape: f32[1,8], index: 4, kind: input, shape index: {}]   ;;  %s639_s5 = inlined_call_operand.vmem [shape: f32[8,8], index: 5, kind: output, shape index: {}]  }
   0x1   :  { %11 = vsyncpa [#allocation6], 0  ;;  %s28_s20 = sshll.u32 %s635_s1, 4  ;;  %s29_s20 = int_to_ptr.hbm [resolvable:$true] %s28_s20 }
   0x2   :  { %12 = vsyncpa [#allocation9], 0  ;;  %s577_s21 = smov [#allocation5]   ;;  %s18_s25 = sshll.u32 %s634_s0, 4  ;;  %s19_s25 = int_to_ptr.hbm [resolvable:$true] %s18_s25 }
   0x3   :  { %s30_s22 = sshll.u32 %s577_s21, 4  ;;  %s578_s26 = smov 128   ;;  %s31_s22 = int_to_ptr.vmem [resolvable:$true] %s30_s22 }
   0x4   :  { %s579_s27 = smov 8   ;;  %s580_s28 = smov [#allocation3]  }
   0x5   :  { %36 = dma.hbm_to_vmem [thread:$0]  %s29_s20, 1024, %s31_s22, [#allocation6], %s578_s26, %s578_s26, %s579_s27  }
   0x6   :  { %s20_s29 = sshll.u32 %s580_s28, 4  ;;  %s42_s7 = sshll.u32 %s636_s2, 4  ;;  %s21_s29 = int_to_ptr.vmem [resolvable:$true] %s20_s29  ;;  %s43_s7 = int_to_ptr.hbm [resolvable:$true] %s42_s7 }
   0x7   :  { %23 = dma.hbm_to_vmem [thread:$0]  %s19_s25, 128, %s21_s29, [#allocation4]  }
   0x8   :  { %s52_s9 = sshll.u32 %s637_s3, 4  ;;  %s581_s10 = smov [#allocation7]   ;;  %s53_s9 = int_to_ptr.hbm [resolvable:$true] %s52_s9 }
   0x9   :  { %s44_s11 = sshll.u32 %s581_s10, 4  ;;  %s582_s0 = smov [#allocation8]   ;;  %s45_s11 = int_to_ptr.vmem [resolvable:$true] %s44_s11 }
   0xa   :  { %47 = dma.hbm_to_vmem [thread:$0]  %s43_s7, 32, %s45_s11, [#allocation6]  }
   0xb   :  { %s54_s12 = sshll.u32 %s582_s0, 4  ;;  %s583_s13 = smov 64   ;;  %s55_s12 = int_to_ptr.vmem [resolvable:$true] %s54_s12 }
   0xc   :  { %s584_s14 = smov 4  }
   0xd   :  { %60 = dma.hbm_to_vmem [thread:$0]  %s53_s9, 2048, %s55_s12, [#allocation9], %s583_s13, %s583_s13, %s584_s14  }
   0xe   :  { %571 = dma.done.wait [#allocation4], 128  }
   0xf   :  { %572 = vsyncadd [#allocation4], 4294967168 }
  0x10   :  { %573 = dma.done.wait [#allocation6], 1056  }
  0x11   :  { %574 = vsyncadd [#allocation6], 4294966240 }
  0x12   :  { %575 = dma.done.wait [#allocation9], 2048  }
  0x13   :  { %576 = vsyncadd [#allocation9], 4294965248  ;;  %vm80_vm0 = vcmask 519168   ;;  %v585_v0 = vmov 0   ;;  %v369_v1 = vld [vmem:[#allocation5 + $0x30] sm:$0xf] }
  0x14   :  { %81 = vst.msk [vmem:[#allocation2] sm:$0xf] %vm80_vm0, %v585_v0  ;;  %v448_v2 = vld [vmem:[#allocation5 + $0x34] sm:$0xf0]  ;;  %v447_v3 = vld [vmem:[#allocation5 + $0x34] sm:$0xf] }
  0x15   :  { %v370_v4 = vor.u32 %v448_v2, %v369_v1  ;;  %v371_v5 = vld [vmem:[#allocation5 + $0x38] sm:$0xf0]  ;;  %v361_v6 = vld [vmem:[#allocation5 + $0x20] sm:$0xf]  ;;  %v446_v7 = vld [vmem:[#allocation5 + $0x24] sm:$0xf0] }
  0x16   :  { %v374_v8 = vor.u32 %v447_v3, %v371_v5  ;;  %v445_v9 = vld [vmem:[#allocation5 + $0x24] sm:$0xf]  ;;  %v363_v10 = vld [vmem:[#allocation5 + $0x28] sm:$0xf0]  ;;  %v362_v11 = vor.u32 %v446_v7, %v361_v6  ;;  %v353_v13 = vld [vmem:[#allocation5 + $0x10] sm:$0xf] }
  0x17   :  { %149 = vmatpush.bf16.msra.mxu0 %v370_v4  ;;  %v366_v12 = vor.u32 %v445_v9, %v363_v10  ;;  %v444_v14 = vld [vmem:[#allocation5 + $0x14] sm:$0xf0]  ;;  %v443_v15 = vld [vmem:[#allocation5 + $0x14] sm:$0xf]  ;;  %v355_v16 = vld [vmem:[#allocation5 + $0x18] sm:$0xf0] }
  0x18   :  { %162 = vmatpush.bf16.msra.mxu1 %v374_v8  ;;  %v82_v17 = vld [vmem:[#allocation3] sm:$0xff]  ;;  %vm84_vm1 = vcmask 420864   ;;  %v354_v21 = vor.u32 %v444_v14, %v353_v13  ;;  %v345_v22 = vld [vmem:[#allocation5] sm:$0xf]  ;;  %v358_v24 = vor.u32 %v443_v15, %v355_v16  ;;  %v442_v25 = vld [vmem:[#allocation5 + $0x4] sm:$0xf0] }
  0x19   :  { %v456_v18 = vld [vmem:[#allocation8 + $0x38] sm:$0xff]  ;;  %v83_v19 = vpack.c.bf16 %v82_v17, %v82_v17  ;;  %v455_v23 = vld [vmem:[#allocation8 + $0x30] sm:$0xff]  ;;  %v441_v27 = vld [vmem:[#allocation5 + $0x4] sm:$0xf]  ;;  %v346_v29 = vor.u32 %v442_v25, %v345_v22  ;;  %vm141_vm2 = vcmask 523264   ;;  %vm334_vm3 = vcmask 64512  }
  0x1a   :  { %v464_v20 = vld [vmem:[#allocation8 + $0x78] sm:$0xff]  ;;  %303 = vmatpush.bf16.msra.mxu2 %v456_v18  ;;  %v463_v26 = vld [vmem:[#allocation8 + $0x70] sm:$0xff]  ;;  %v347_v28 = vld [vmem:[#allocation5 + $0x8] sm:$0xf0] }
  0x1b   :  { %150 = vmatpush.bf16.msra.mxu0 %v362_v11  ;;  %85 = vst.msk [vmem:[#allocation2] sm:$0xf] %vm84_vm1, %v83_v19  ;;  %316 = vmatpush.bf16.msra.mxu3 %v464_v20  ;;  %v454_v30 = vld [vmem:[#allocation8 + $0x28] sm:$0xff]  ;;  %v350_v31 = vor.u32 %v441_v27, %v347_v28  ;;  %v453_v34 = vld [vmem:[#allocation8 + $0x20] sm:$0xff]  ;;  %v452_v36 = vld [vmem:[#allocation8 + $0x18] sm:$0xff] }
  0x1c   :  { %163 = vmatpush.bf16.msra.mxu1 %v366_v12  ;;  %v462_v32 = vld [vmem:[#allocation8 + $0x68] sm:$0xff]  ;;  %v461_v35 = vld [vmem:[#allocation8 + $0x60] sm:$0xff]  ;;  %v460_v37 = vld [vmem:[#allocation8 + $0x58] sm:$0xff] }
  0x1d   :  { %v451_v38 = vld [vmem:[#allocation8 + $0x10] sm:$0xff]  ;;  %v450_v40 = vld [vmem:[#allocation8 + $0x8] sm:$0xff]  ;;  %v449_v42 = vld [vmem:[#allocation8] sm:$0xff] }
  0x1e   :  { %304 = vmatpush.bf16.msra.mxu2 %v455_v23  ;;  %v459_v39 = vld [vmem:[#allocation8 + $0x50] sm:$0xff]  ;;  %v458_v41 = vld [vmem:[#allocation8 + $0x48] sm:$0xff]  ;;  %v457_v43 = vld [vmem:[#allocation8 + $0x40] sm:$0xff] }
  0x1f   :  { %151 = vmatpush.bf16.msra.mxu0 %v354_v21  ;;  %317 = vmatpush.bf16.msra.mxu3 %v463_v26  ;;  %v95_v44 = vld [vmem:[#allocation7] sm:$0x3]  ;;  %v474_v58 = vld [vmem:[%s638_s4] ss:$0 sm:$0xff] }
  0x20   :  { %164 = vmatpush.bf16.msra.mxu1 %v358_v24  ;;  %v97_v45 = vperm.slane %v95_v44, 0  ;;  %v98_v46 = vperm.slane %v95_v44, 1 }
  0x22   :  { %v86_v33 = vld [vmem:[#allocation2] sm:$0xf]  ;;  %305 = vmatpush.bf16.msra.mxu2 %v454_v30 }
  0x23   :  { %152 = vmatpush.bf16.msra.mxu0 %v346_v29  ;;  %318 = vmatpush.bf16.msra.mxu3 %v462_v32 }
  0x24   :  { %165 = vmatpush.bf16.msra.mxu1 %v350_v31 }
  0x26   :  { %375 = vmatmul.msk.bf16.vlgmr.msra.gmra.mxu0 %vm141_vm2, %v86_v33  ;;  %306 = vmatpush.bf16.msra.mxu2 %v453_v34 }
  0x27   :  { %376 = vmatmul.msk.bf16.vlgmr.msra.gmra.mxu1 %vm141_vm2, %v86_v33  ;;  %319 = vmatpush.bf16.msra.mxu3 %v461_v35 }
  0x2a   :  { %307 = vmatpush.bf16.msra.mxu2 %v452_v36 }
  0x2b   :  { %320 = vmatpush.bf16.msra.mxu3 %v460_v37 }
  0x2e   :  { %308 = vmatpush.bf16.msra.mxu2 %v451_v38 }
  0x2f   :  { %321 = vmatpush.bf16.msra.mxu3 %v459_v39 }
  0x32   :  { %309 = vmatpush.bf16.msra.mxu2 %v450_v40 }
  0x33   :  { %322 = vmatpush.bf16.msra.mxu3 %v458_v41 }
  0x36   :  { %310 = vmatpush.bf16.msra.mxu2 %v449_v42 }
  0x37   :  { %323 = vmatpush.bf16.msra.mxu3 %v457_v43 }
  0xa3   :  { %v154_v47 = vpop.f32.mrf.mxu0 }
  0xa4   :  { %v155_v48 = vadd.f32 %v154_v47, %v97_v45  ;;  %v167_v49 = vpop.f32.mrf.mxu1 }
  0xa5   :  { %v168_v50 = vadd.f32 %v167_v49, %v98_v46 }
  0xa6   :  { %v171_v51 = vmax.f32 %v155_v48, 0.0 }
  0xa7   :  { %v172_v52 = vmax.f32 %v168_v50, 0.0 }
  0xa8   :  { %v173_v53 = vpack.c.bf16 %v171_v51, %v171_v51 }
  0xa9   :  { %v174_v54 = vpack.c.bf16 %v172_v52, %v172_v52 }
  0xaa   :  { %311 = vmatmul.bf16.vlgmr.msra.gmra.mxu2 %v173_v53 }
  0xab   :  { %324 = vmatmul.bf16.vlgmr.msra.gmra.mxu3 %v174_v54  ;;  %v156_v55 = vpop.f32.mrf.mxu0 }
  0xac   :  { %v169_v56 = vpop.f32.mrf.mxu1 }
 0x12d   :  { %v312_v57 = vpop.f32.mrf.mxu2 }
 0x12e   :  { %v325_v59 = vpop.f32.mrf.mxu3 }
 0x12f   :  { %v326_v60 = vadd.f32 %v325_v59, %v312_v57 }
 0x131   :  { %v333_v61 = vadd.f32 %v474_v58, %v326_v60 }
 0x133   :  { %335 = vst.msk [vmem:[%s639_s5] sm:$0xff] %vm334_vm3, %v333_v61 }
 0x135   :  { %v314_v62 = vpop.f32.mrf.mxu2 }
 0x136   :  { %v327_v63 = vpop.f32.mrf.mxu3 }
 0x137   :  { %340 = vsyncpa [#allocation4], 1 }
 0x138   :  { %341 = vsyncpa [#allocation6], 1 }
 0x139   :  { %342 = vsyncpa [#allocation9], 1 }

</bundles_post_ra>
